<compile_context>
chip_gen: v6e
topology: v6e:2x2x1
jax: 0.10.0
libtpu: 0.0.40
codegen_flags: <defaults>
</compile_context>

<pallas_src>
import jax
import jax.numpy as jnp
from jax.experimental import pallas as pl
from jax.experimental.pallas import tpu as pltpu


def _round_up(x: int, m: int) -> int:
    return ((x + m - 1) // m) * m


_BUFFERED = getattr(pl, "Buffered", None)


def _buffered(n):
    return _BUFFERED(n) if _BUFFERED is not None else None


def _bspec(shape, index_map, mode=None):
    """BlockSpec with optional pipeline_mode (graceful fallback)."""
    if mode is None:
        return pl.BlockSpec(shape, index_map)
    try:
        return pl.BlockSpec(shape, index_map, pipeline_mode=mode)
    except TypeError:
        return pl.BlockSpec(shape, index_map)


def make_ffn_kernel(eps: float, d_true: int, d_pad: int, bf16_matmul: bool):
    mm_dtype = jnp.bfloat16 if bf16_matmul else jnp.float32
    inv_d = 1.0 / float(d_true)

    def ffn_kernel(x_ref, w1_ref, b1_ref, w2_ref, b2_ref, g_ref, beta_ref,
                   o_ref, acc_ref):
        f = pl.program_id(1)

        @pl.when(f == 0)
        def _():
            acc_ref[...] = jnp.zeros_like(acc_ref)

        # ---- linear1 + relu + linear2 partial sum over this ff tile --------
        xm = x_ref[...].astype(mm_dtype)
        h = jnp.dot(xm, w1_ref[...], preferred_element_type=jnp.float32)
        h = jnp.maximum(h + b1_ref[...], 0.0)
        acc_ref[...] += jnp.dot(h.astype(mm_dtype), w2_ref[...],
                                preferred_element_type=jnp.float32)

        # ---- epilogue on last ff tile: residual + LayerNorm -----------------
        @pl.when(f == pl.num_programs(1) - 1)
        def _():
            z = x_ref[...].astype(jnp.float32) + acc_ref[...] + b2_ref[...]
            # padded lanes of z are exactly zero (padded x, W2 cols, b2), so an
            # unmasked sum already gives the true-lane mean.
            mean = jnp.sum(z, axis=-1, keepdims=True) * inv_d
            cen = z - mean
            if d_pad != d_true:
                lane = jax.lax.broadcasted_iota(jnp.int32, (1, d_pad), 1)
                cen_stat = cen * (lane < d_true).astype(jnp.float32)
            else:
                cen_stat = cen
            var = jnp.sum(cen_stat * cen_stat, axis=-1, keepdims=True) * inv_d
            zn = cen * jax.lax.rsqrt(var + eps)
            # padded gamma/beta lanes are zero -> padded output lanes are zero
            o_ref[...] = (zn * g_ref[...] + beta_ref[...]).astype(o_ref.dtype)

    return ffn_kernel


def ff_layer(tgt, w1, b1, w2, b2, gamma, beta, *, eps=1e-5, tm=512,
             bf16_matmul=True):
    """tgt: [B, S, d_model]; w1 = linear1.weight.T  [d_model, dim_ff];
    w2 = linear2.weight.T  [dim_ff, d_model]."""
    B, S, D = tgt.shape
    F = w1.shape[1]
    M = B * S

    # ---- generation-aware sizing -------------------------------------------
    dev_kind = jax.devices()[0].device_kind.lower()
    wide_mxu = ("v6" in dev_kind) or ("v7" in dev_kind)       # 2x256x256 MXU
    d_align = 256 if (wide_mxu and D >= 256) else 128
    f_align = 256 if (wide_mxu and F >= 256) else 128
    D_pad = _round_up(D, d_align)
    F_pad0 = _round_up(F, f_align)

    try:
        vmem_cap = int(pltpu.get_tpu_info().vmem_capacity_bytes)
    except Exception:
        vmem_cap = (64 if "v7" in dev_kind else 128) * 1024 * 1024

    # Token tile: large, sublane-aligned, no padding of M (tail block handled
    # by the cdiv grid's masked last block).  Keep >=2 token tiles whenever M
    # allows so the "parallel" axis can span both v7x TensorCores.
    tm = max(8, min(tm, _round_up(M, 8)))
    if M > 8 and pl.cdiv(M, tm) < 2:
        tm = max(8, _round_up(pl.cdiv(M, 2), 8))

    xb = jnp.dtype(tgt.dtype).itemsize
    wb = 2 if bf16_matmul else 4

    def est_vmem(tm_, tf_):
        nf_ = pl.cdiv(F_pad0, tf_)
        wbuf = 1 if nf_ == 1 else 2          # resident weights -> single buffer
        return (wbuf * 2 * D_pad * tf_ * wb          # W1 + W2 tiles
                + wbuf * tf_ * 4                     # b1 tile
                + 3 * D_pad * 4                      # b2, gamma, beta
                + 2 * tm_ * D_pad * xb               # x tile (double buffered)
                + 2 * tm_ * D_pad * xb               # out tile (double buffered)
                + tm_ * D_pad * 4                    # f32 accumulator scratch
                + tm_ * tf_ * (4 + wb)               # h (f32) + cast copy
                + 4 * tm_ * D_pad * 4)               # epilogue temporaries

    budget = int(0.70 * vmem_cap)
    tf = F_pad0
    while est_vmem(tm, tf) > budget and tm > 128:
        tm = max(128, _round_up(tm // 2, 8))
    while est_vmem(tm, tf) > budget and tf > f_align:
        tf = max(f_align, _round_up(tf // 2, f_align))
    F_pad = _round_up(F_pad0, tf)
    nf = F_pad // tf
    ni = pl.cdiv(M, tm)

    # ---- operand prep (pads only when dims are not lane-aligned) ------------
    x2d = tgt.reshape(M, D)
    if D_pad != D:
        x2d = jnp.pad(x2d, ((0, 0), (0, D_pad - D)))

    w_dtype = jnp.bfloat16 if bf16_matmul else jnp.float32
    # TODO(synk): fp8 (v7x) / int8 (v5e,v6e) weight quantisation would halve
    #             resident-weight VMEM further; omitted to preserve accuracy.
    w1p = w1.astype(w_dtype)
    w2p = w2.astype(w_dtype)
    if w1p.shape != (D_pad, F_pad):
        w1p = jnp.pad(w1p, ((0, D_pad - D), (0, F_pad - F)))
    if w2p.shape != (F_pad, D_pad):
        w2p = jnp.pad(w2p, ((0, F_pad - F), (0, D_pad - D)))
    b1p = jnp.pad(b1.astype(jnp.float32), (0, F_pad - F)).reshape(1, F_pad)
    b2p = jnp.pad(b2.astype(jnp.float32), (0, D_pad - D)).reshape(1, D_pad)
    g_p = jnp.pad(gamma.astype(jnp.float32), (0, D_pad - D)).reshape(1, D_pad)
    be_p = jnp.pad(beta.astype(jnp.float32), (0, D_pad - D)).reshape(1, D_pad)

    # Operands whose block index never changes need only a single VMEM buffer;
    # streamed weights (nf > 1) keep double-buffering to hide their DMA.
    w_mode = _buffered(1) if nf == 1 else _buffered(2)
    const_mode = _buffered(1)

    in_specs = [
        _bspec((tm, D_pad), lambda i, f: (i, 0)),                 # x tile
        _bspec((D_pad, tf), lambda i, f: (0, f), w_mode),         # W1
        _bspec((1, tf), lambda i, f: (0, f), w_mode),             # b1
        _bspec((tf, D_pad), lambda i, f: (f, 0), w_mode),         # W2
        _bspec((1, D_pad), lambda i, f: (0, 0), const_mode),      # b2
        _bspec((1, D_pad), lambda i, f: (0, 0), const_mode),      # LN gamma
        _bspec((1, D_pad), lambda i, f: (0, 0), const_mode),      # LN beta
    ]
    out_specs = pl.BlockSpec((tm, D_pad), lambda i, f: (i, 0))

    flops = 4 * M * D_pad * F_pad
    weight_bytes = (w1p.size + w2p.size) * wb + (F_pad + 3 * D_pad) * 4
    bytes_accessed = 2 * M * D_pad * xb + weight_bytes * (ni if nf > 1 else 1)
    cost = pl.CostEstimate(flops=flops, transcendentals=M,
                           bytes_accessed=bytes_accessed)

    est = est_vmem(tm, tf)
    vmem_limit = int(min(0.85 * vmem_cap, max(32 * 1024 * 1024, int(1.5 * est))))
    vmem_limit = max(vmem_limit, est + (4 << 20))
    vmem_limit = int(min(vmem_limit, int(0.9 * vmem_cap)))

    out2d = pl.pallas_call(
        make_ffn_kernel(eps, D, D_pad, bf16_matmul),
        out_shape=jax.ShapeDtypeStruct((M, D_pad), tgt.dtype),
        grid_spec=pltpu.PrefetchScalarGridSpec(
            num_scalar_prefetch=0,
            grid=(ni, nf),
            in_specs=in_specs,
            out_specs=out_specs,
            scratch_shapes=[pltpu.VMEM((tm, D_pad), jnp.float32)],
        ),
        compiler_params=pltpu.CompilerParams(
            dimension_semantics=("parallel", "arbitrary"),
            vmem_limit_bytes=vmem_limit,
        ),
        cost_estimate=cost,
    )(x2d, w1p, b1p, w2p, b2p, g_p, be_p)

    out2d = out2d if D_pad == D else out2d[:, :D]
    return out2d.reshape(B, S, D)


if __name__ == "__main__":
    # Small shapes consistent with the module: d_model=32, dim_feedforward=64
    B, S, D, F = 2, 8, 32, 64
    key = jax.random.PRNGKey(0)
    k_x, k_w1, k_b1, k_w2, k_b2 = jax.random.split(key, 5)

    tgt = jax.random.normal(k_x, (B, S, D), dtype=jnp.float32)

    # Linear weights stored transposed vs PyTorch: w1 = linear1.weight.T
    w1 = jax.random.normal(k_w1, (D, F), dtype=jnp.float32) * 0.05
    b1 = jax.random.normal(k_b1, (F,), dtype=jnp.float32) * 0.05
    w2 = jax.random.normal(k_w2, (F, D), dtype=jnp.float32) * 0.05
    b2 = jax.random.normal(k_b2, (D,), dtype=jnp.float32) * 0.05
    gamma = jnp.ones((D,), dtype=jnp.float32)   # nn.LayerNorm weight init
    beta = jnp.zeros((D,), dtype=jnp.float32)   # nn.LayerNorm bias init

    out = ff_layer(tgt, w1, b1, w2, b2, gamma, beta, eps=1e-5)
    out = jax.block_until_ready(out)

    # Pure-JAX f32 reference (bf16 MXU inputs -> small numerical drift allowed)
    h = jnp.maximum(tgt @ w1 + b1, 0.0)
    y = h @ w2 + b2
    z = tgt + y
    mean = z.mean(-1, keepdims=True)
    var = ((z - mean) ** 2).mean(-1, keepdims=True)
    ref = (z - mean) / jnp.sqrt(var + 1e-5) * gamma + beta
    err = float(jnp.max(jnp.abs(out - ref)))
    assert jnp.allclose(out, ref, atol=1e-2, rtol=1e-2), err

    print("KERNEL_OK")
</pallas_src>

<mosaic_0001>
module attributes {stable_mosaic.version = 11 : i64} {
  func.func @ffn_kernel(%arg0: i32, %arg1: i32, %arg2: memref<8x128xf32, #tpu.memory_space<vmem>>, %arg3: memref<128x128xbf16, #tpu.memory_space<vmem>>, %arg4: memref<1x128xf32, #tpu.memory_space<vmem>>, %arg5: memref<128x128xbf16, #tpu.memory_space<vmem>>, %arg6: memref<1x128xf32, #tpu.memory_space<vmem>>, %arg7: memref<1x128xf32, #tpu.memory_space<vmem>>, %arg8: memref<1x128xf32, #tpu.memory_space<vmem>>, %arg9: memref<8x128xf32, #tpu.memory_space<vmem>>, %arg10: memref<8x128xf32, #tpu.memory_space<vmem>>) attributes {dimension_semantics = [#tpu.dimension_semantics<parallel>, #tpu.dimension_semantics<arbitrary>], iteration_bounds = array<i64: 2, 1>, scalar_prefetch = 0 : i64, scratch_operands = 1 : i64, tpu.core_type = #tpu.core_type<tc>, window_params = [{transform_indices = @transform_0, window_bounds = array<i64: 8, 128>}, {pipeline_mode = #tpu.pipeline_mode<synchronous>, transform_indices = @transform_1, window_bounds = array<i64: 128, 128>}, {pipeline_mode = #tpu.pipeline_mode<synchronous>, transform_indices = @transform_2, window_bounds = array<i64: 1, 128>}, {pipeline_mode = #tpu.pipeline_mode<synchronous>, transform_indices = @transform_3, window_bounds = array<i64: 128, 128>}, {pipeline_mode = #tpu.pipeline_mode<synchronous>, transform_indices = @transform_4, window_bounds = array<i64: 1, 128>}, {pipeline_mode = #tpu.pipeline_mode<synchronous>, transform_indices = @transform_5, window_bounds = array<i64: 1, 128>}, {pipeline_mode = #tpu.pipeline_mode<synchronous>, transform_indices = @transform_6, window_bounds = array<i64: 1, 128>}, {transform_indices = @transform_7, window_bounds = array<i64: 8, 128>}]} {
    %c0_i32 = arith.constant 0 : i32
    %0 = arith.cmpi eq, %arg1, %c0_i32 : i32
    %1 = arith.extui %0 : i1 to i32
    %c0_i32_0 = arith.constant 0 : i32
    %2 = arith.cmpi ne, %1, %c0_i32_0 : i32
    scf.if %2 {
      %cst_16 = arith.constant 0.000000e+00 : f32
      %21 = vector.broadcast %cst_16 : f32 to vector<8x128xf32>
      %c0_17 = arith.constant 0 : index
      %c0_18 = arith.constant 0 : index
      %22 = vector.load %arg10[%c0_17, %c0_18] : memref<8x128xf32, #tpu.memory_space<vmem>>, vector<8x128xf32>
      tpu.vector_store %arg10[%c0_17, %c0_18], %21 {strides = array<i32>} : memref<8x128xf32, #tpu.memory_space<vmem>>, vector<8x128xf32>,
    } else {
    }
    %c0 = arith.constant 0 : index
    %c0_1 = arith.constant 0 : index
    %3 = vector.load %arg2[%c0, %c0_1] : memref<8x128xf32, #tpu.memory_space<vmem>>, vector<8x128xf32>
    %4 = arith.truncf %3 : vector<8x128xf32> to vector<8x128xbf16>
    %c0_2 = arith.constant 0 : index
    %c0_3 = arith.constant 0 : index
    %5 = vector.load %arg3[%c0_2, %c0_3] : memref<128x128xbf16, #tpu.memory_space<vmem>>, vector<128x128xbf16>
    %cst = arith.constant dense<0.000000e+00> : vector<8x128xf32>
    %6 = tpu.matmul %4, %5, %cst {dimension_numbers = #tpu.dot_dimension_numbers<[1], [0], [0], [1], [0, 0, 1, 1], [], []>} : vector<8x128xbf16>, vector<128x128xbf16>, vector<8x128xf32> -> vector<8x128xf32>
    %c0_4 = arith.constant 0 : index
    %c0_5 = arith.constant 0 : index
    %7 = vector.load %arg4[%c0_4, %c0_5] : memref<1x128xf32, #tpu.memory_space<vmem>>, vector<1x128xf32>
    %8 = vector.broadcast %7 : vector<1x128xf32> to vector<8x128xf32>
    %9 = arith.addf %6, %8 : vector<8x128xf32>
    %cst_6 = arith.constant 0.000000e+00 : f32
    %10 = vector.broadcast %cst_6 : f32 to vector<8x128xf32>
    %11 = arith.maximumf %9, %10 : vector<8x128xf32>
    %c0_7 = arith.constant 0 : index
    %c0_8 = arith.constant 0 : index
    %12 = vector.load %arg10[%c0_7, %c0_8] : memref<8x128xf32, #tpu.memory_space<vmem>>, vector<8x128xf32>
    %13 = arith.truncf %11 : vector<8x128xf32> to vector<8x128xbf16>
    %c0_9 = arith.constant 0 : index
    %c0_10 = arith.constant 0 : index
    %14 = vector.load %arg5[%c0_9, %c0_10] : memref<128x128xbf16, #tpu.memory_space<vmem>>, vector<128x128xbf16>
    %cst_11 = arith.constant dense<0.000000e+00> : vector<8x128xf32>
    %15 = tpu.matmul %13, %14, %cst_11 {dimension_numbers = #tpu.dot_dimension_numbers<[1], [0], [0], [1], [0, 0, 1, 1], [], []>} : vector<8x128xbf16>, vector<128x128xbf16>, vector<8x128xf32> -> vector<8x128xf32>
    %16 = arith.addf %12, %15 : vector<8x128xf32>
    %c0_12 = arith.constant 0 : index
    %c0_13 = arith.constant 0 : index
    %17 = vector.load %arg10[%c0_12, %c0_13] : memref<8x128xf32, #tpu.memory_space<vmem>>, vector<8x128xf32>
    tpu.vector_store %arg10[%c0_12, %c0_13], %16 {strides = array<i32>} : memref<8x128xf32, #tpu.memory_space<vmem>>, vector<8x128xf32>,
    %c0_i32_14 = arith.constant 0 : i32
    %18 = arith.cmpi eq, %arg1, %c0_i32_14 : i32
    %19 = arith.extui %18 : i1 to i32
    %c0_i32_15 = arith.constant 0 : i32
    %20 = arith.cmpi ne, %19, %c0_i32_15 : i32
    scf.if %20 {
      %c0_16 = arith.constant 0 : index
      %c0_17 = arith.constant 0 : index
      %21 = vector.load %arg2[%c0_16, %c0_17] : memref<8x128xf32, #tpu.memory_space<vmem>>, vector<8x128xf32>
      %c0_18 = arith.constant 0 : index
      %c0_19 = arith.constant 0 : index
      %22 = vector.load %arg10[%c0_18, %c0_19] : memref<8x128xf32, #tpu.memory_space<vmem>>, vector<8x128xf32>
      %23 = arith.addf %21, %22 : vector<8x128xf32>
      %c0_20 = arith.constant 0 : index
      %c0_21 = arith.constant 0 : index
      %24 = vector.load %arg6[%c0_20, %c0_21] : memref<1x128xf32, #tpu.memory_space<vmem>>, vector<1x128xf32>
      %25 = vector.broadcast %24 : vector<1x128xf32> to vector<8x128xf32>
      %26 = arith.addf %23, %25 : vector<8x128xf32>
      %cst_22 = arith.constant dense<0.000000e+00> : vector<8xf32>
      %27 = vector.multi_reduction <add>, %26, %cst_22 [1] : vector<8x128xf32> to vector<8xf32>
      %28 = vector.shape_cast %27 : vector<8xf32> to vector<8x1xf32>
      %cst_23 = arith.constant 3.125000e-02 : f32
      %29 = vector.broadcast %cst_23 : f32 to vector<8x1xf32>
      %30 = arith.mulf %28, %29 : vector<8x1xf32>
      %31 = vector.broadcast %30 : vector<8x1xf32> to vector<8x128xf32>
      %32 = arith.subf %26, %31 : vector<8x128xf32>
      %33 = tpu.iota {dimensions = array<i32: 1>} : vector<1x128xi32>
      %c32_i32 = arith.constant 32 : i32
      %34 = vector.broadcast %c32_i32 : i32 to vector<1x128xi32>
      %35 = arith.cmpi slt, %33, %34 : vector<1x128xi32>
      %36 = arith.extui %35 : vector<1x128xi1> to vector<1x128xi32>
      %37 = arith.sitofp %36 : vector<1x128xi32> to vector<1x128xf32>
      %38 = vector.broadcast %37 : vector<1x128xf32> to vector<8x128xf32>
      %39 = arith.mulf %32, %38 : vector<8x128xf32>
      %40 = arith.mulf %39, %39 : vector<8x128xf32>
      %cst_24 = arith.constant dense<0.000000e+00> : vector<8xf32>
      %41 = vector.multi_reduction <add>, %40, %cst_24 [1] : vector<8x128xf32> to vector<8xf32>
      %42 = vector.shape_cast %41 : vector<8xf32> to vector<8x1xf32>
      %cst_25 = arith.constant 3.125000e-02 : f32
      %43 = vector.broadcast %cst_25 : f32 to vector<8x1xf32>
      %44 = arith.mulf %42, %43 : vector<8x1xf32>
      %cst_26 = arith.constant 9.99999974E-6 : f32
      %45 = vector.broadcast %cst_26 : f32 to vector<8x1xf32>
      %46 = arith.addf %44, %45 : vector<8x1xf32>
      %47 = math.rsqrt %46 : vector<8x1xf32>
      %48 = vector.broadcast %47 : vector<8x1xf32> to vector<8x128xf32>
      %49 = arith.mulf %32, %48 : vector<8x128xf32>
      %c0_27 = arith.constant 0 : index
      %c0_28 = arith.constant 0 : index
      %50 = vector.load %arg7[%c0_27, %c0_28] : memref<1x128xf32, #tpu.memory_space<vmem>>, vector<1x128xf32>
      %51 = vector.broadcast %50 : vector<1x128xf32> to vector<8x128xf32>
      %52 = arith.mulf %49, %51 : vector<8x128xf32>
      %c0_29 = arith.constant 0 : index
      %c0_30 = arith.constant 0 : index
      %53 = vector.load %arg8[%c0_29, %c0_30] : memref<1x128xf32, #tpu.memory_space<vmem>>, vector<1x128xf32>
      %54 = vector.broadcast %53 : vector<1x128xf32> to vector<8x128xf32>
      %55 = arith.addf %52, %54 : vector<8x128xf32>
      %c0_31 = arith.constant 0 : index
      %c0_32 = arith.constant 0 : index
      %56 = vector.load %arg9[%c0_31, %c0_32] : memref<8x128xf32, #tpu.memory_space<vmem>>, vector<8x128xf32>
      tpu.vector_store %arg9[%c0_31, %c0_32], %55 {strides = array<i32>} : memref<8x128xf32, #tpu.memory_space<vmem>>, vector<8x128xf32>,
    } else {
    }
    return
  }
  func.func @transform_0(%arg0: i32, %arg1: i32) -> (i32, i32) {
    %c0_i32 = arith.constant 0 : i32
    %c0_i32_0 = arith.constant 0 : i32
    return %arg0, %c0_i32 : i32, i32
  }
  func.func @transform_1(%arg0: i32, %arg1: i32) -> (i32, i32) {
    %c0_i32 = arith.constant 0 : i32
    %c0_i32_0 = arith.constant 0 : i32
    return %c0_i32, %arg1 : i32, i32
  }
  func.func @transform_2(%arg0: i32, %arg1: i32) -> (i32, i32) {
    %c0_i32 = arith.constant 0 : i32
    %c0_i32_0 = arith.constant 0 : i32
    return %c0_i32, %arg1 : i32, i32
  }
  func.func @transform_3(%arg0: i32, %arg1: i32) -> (i32, i32) {
    %c0_i32 = arith.constant 0 : i32
    %c0_i32_0 = arith.constant 0 : i32
    return %arg1, %c0_i32 : i32, i32
  }
  func.func @transform_4(%arg0: i32, %arg1: i32) -> (i32, i32) {
    %c0_i32 = arith.constant 0 : i32
    %c0_i32_0 = arith.constant 0 : i32
    %c0_i32_1 = arith.constant 0 : i32
    return %c0_i32, %c0_i32_0 : i32, i32
  }
  func.func @transform_5(%arg0: i32, %arg1: i32) -> (i32, i32) {
    %c0_i32 = arith.constant 0 : i32
    %c0_i32_0 = arith.constant 0 : i32
    %c0_i32_1 = arith.constant 0 : i32
    return %c0_i32, %c0_i32_0 : i32, i32
  }
  func.func @transform_6(%arg0: i32, %arg1: i32) -> (i32, i32) {
    %c0_i32 = arith.constant 0 : i32
    %c0_i32_0 = arith.constant 0 : i32
    %c0_i32_1 = arith.constant 0 : i32
    return %c0_i32, %c0_i32_0 : i32, i32
  }
  func.func @transform_7(%arg0: i32, %arg1: i32) -> (i32, i32) {
    %c0_i32 = arith.constant 0 : i32
    %c0_i32_0 = arith.constant 0 : i32
    return %arg0, %c0_i32 : i32, i32
  }
}

</mosaic_0001>

<bundles_post_ra>
// kernel: tpu_custom_call.1
= control target key start
LH: loop header
LB: loop body
LE: loop exit
PB: predicated region body
PF: predicated region fallthrough
CT: control target
= control target key end

     0   :  { %s1396_s0 = inlined_call_operand.hbm [shape: f32[16,128], index: 0, kind: input, shape index: {}]   ;;  %s1397_s1 = inlined_call_operand.hbm [shape: bf16[128,128], index: 1, kind: input, shape index: {}]   ;;  %s1398_s2 = inlined_call_operand.vmem [shape: f32[1,128], index: 2, kind: input, shape index: {}]   ;;  %s1399_s3 = inlined_call_operand.hbm [shape: bf16[128,128], index: 3, kind: input, shape index: {}]   ;;  %s1400_s4 = inlined_call_operand.vmem [shape: f32[1,128], index: 4, kind: input, shape index: {}]   ;;  %s1401_s5 = inlined_call_operand.vmem [shape: f32[1,128], index: 5, kind: input, shape index: {}]   ;;  %s1402_s6 = inlined_call_operand.vmem [shape: f32[1,128], index: 6, kind: input, shape index: {}]   ;;  %s1403_s7 = inlined_call_operand.hbm [shape: f32[16,128], index: 7, kind: output, shape index: {}]  }
   0x1   :  { %1408 = sst [smem:[#allocation14_spill]] %s1397_s1 }
   0x2   :  { %1409 = sst [smem:[#allocation15_spill]] %s1399_s3 }
   0x3   :  { %12 = vsyncpa [#allocation4], 0 }
   0x4   :  { %14 = vsyncpa [#allocation4 + $0x1], 0 }
   0x5   :  { %15 = vsyncpa [#allocation7], 0 }
   0x6   :  { %16 = vsyncpa [#allocation5], 0 }
   0x7   :  { %18 = vsyncpa [#allocation5 + $0x1], 0  ;;  %s1184_s24 = smov 0   ;;  %s1186_s25 = smov 0  }
   0x8   :  { %s1188_s26 = smov 0   ;;  %s1190_s27 = smov 0  }
   0x9   :  { %s1192_s28 = smov 0   ;;  %s1194_s29 = smov 0  }
   0xa LB: > { %s768_s30 = sadd.s32 4294967295, %s1134_s29   ;;  %s769_s8 = sadd.s32 4294967294, %s1134_s29   ;;  %s1134_s29 = sphi %s1194_s29, %s24_s29   ;;  %s1130_s28 = sphi %s1192_s28, %s1430_s28   ;;  %s1126_s27 = sphi %s1190_s27, %s1429_s27   ;;  %s1122_s26 = sphi %s1188_s26, %s1428_s26   ;;  %s1118_s25 = sphi %s1186_s25, %s1427_s25   ;;  %s1114_s24 = sphi %s1184_s24, %s1426_s24  }
   0xb   : > { %p56_p0 = scmp.ne.s32.totalorder %s1118_s25, %s1114_s24  ;;  %p1218_p1 = scmp.eq.s32.totalorder %s768_s30, 0 }
   0xc   : > { %p1222_p2 = scmp.eq.s32.totalorder %s768_s30, 1  ;;  %p227_p3 = scmp.eq.s32.totalorder %s769_s8, 1 }
   0xd   : > { %s1410_s9 = scalar_select %p1218_p1, 1, 0 }
   0xe   : > { %p1228_p4 = por %p1218_p1, %p56_p0  ;;  %p770_p5 = scmp.ge.s32.totalorder %s1134_s29, 1 }
   0xf   : > { %p1233_p6 = por %p227_p3, %p56_p0  ;;  %p234_p7 = scmp.lt.s32.totalorder %s1134_s29, 3 }
  0x10   : > { %s1412_s11 = scalar_select %p1228_p4, 1, 0 }
  0x11   : > { %s1413_s12 = scalar_select %p1233_p6, 1, 0 }
  0x12   : > { %p1238_p8 = pnand %p770_p5, %p234_p7  ;;  %s1136_s14 = smov [#allocation6]  }
  0x13   : > { %s248_s15 = sshll.u32 %s1136_s14, 4  ;;  %s1137_s17 = smov [#allocation8]   ;;  %s249_s15 = int_to_ptr.vmem [resolvable:$true] %s248_s15 }
  0x14   : > { %p877_p9 = pneg %p1238_p8  ;;  %s270_s18 = sshll.u32 %s1137_s17, 4  ;;  %s271_s18 = int_to_ptr.vmem [resolvable:$true] %s270_s18 }
  0x15   : > { %s981_s19 = scalar_lea.vmem %s249_s15, 1024  ;;  %p989_p5 = scmp.lt.s32.totalorder %s249_s15, %s249_s15 }
  0x16   : > { %p1247_p11 = pnand %p877_p9, %p1218_p1  ;;  %p982_p13 = scmp.ne.s32.totalorder %s249_s15, %s981_s19 }
  0x17   : > { %p990_p7 = scmp.lt.s32.totalorder %s981_s19, %s981_s19 }
  0x18   : > { %p972_p12 = pneg %p1247_p11 }
  0x19   : > { %p991_p10 = por %p990_p7, %p989_p5 }
  0x1a   : > { %p984_p0 = pnand %p982_p13, %p972_p12 }
  0x1c   : > { %p985_p3 = pneg %p984_p0 }
  0x1e   : > { %p992_p9 = pnand %p991_p10, %p985_p3 }
  0x20   : > { %995 = shalt.err (!%p992_p9)
}
  0x21   : > { %s1138_s20 = smov 64   ;;  %s1139_s21 = smov 4  }
  0x22   : > { %s1416_s1 = sld [smem:[#allocation14_spill]]  ;;  %s1007_s30 = scalar_lea.vmem %s271_s18, 1024 }
  0x23   : > { %p1008_p6 = scmp.ne.s32.totalorder %s271_s18, %s1007_s30  ;;  %p1015_p1 = scmp.lt.s32.totalorder %s271_s18, %s271_s18 }
  0x24   : > { %p1016_p4 = scmp.lt.s32.totalorder %s1007_s30, %s1007_s30 }
  0x25   : > { %p1010_p13 = pnand %p1008_p6, %p972_p12 }
  0x26   : > { %p1017_p5 = por %p1016_p4, %p1015_p1 }
  0x27   : > { %p1011_p0 = pneg %p1010_p13 }
  0x28   : > { %880 = dma.hbm_to_vmem [thread:$0]  (!%p1247_p11), %s1416_s1, 1024, %s249_s15, [#allocation7], %s1138_s20, %s1138_s20, %s1139_s21  }
  0x29   : > { %p1018_p10 = pnand %p1017_p5, %p1011_p0 }
  0x2b   : > { %1021 = shalt.err (!%p1018_p10)
}
  0x2c   : > { %s1417_s3 = sld [smem:[#allocation15_spill]]  ;;  %s36_s15 = sadd.s32 1, %s1130_s28 }
  0x2d   : > { %s43_s17 = sadd.s32 1, %s1122_s26  ;;  %p38_p1 = scmp.ge.s32.totalorder %s36_s15, 2 }
  0x2e   : > { %p50_p4 = scmp.ne.s32.totalorder %s1122_s26, %s1118_s25  ;;  %p51_p6 = scmp.eq.s32.totalorder %s1134_s29, 0 }
  0x2f   : > { %p894_p12 = scmp.lt.s32.totalorder %s1134_s29, 2  ;;  %s1432_s15 = smov (%p38_p1, %s36_s15), 0 }
  0x30   : > { %1418 = sst [smem:[#allocation13_spill]] %s1432_s15  ;;  %p52_p3 = por %p51_p6, %p50_p4 }
  0x31   : > { %p1279_p7 = por %p1222_p2, %p50_p4  ;;  %s40_s19 = ssub.s32 %s1130_s28, %s1432_s15 }
  0x32   : > { %883 = dma.hbm_to_vmem [thread:$0]  (!%p1247_p11), %s1417_s3, 1024, %s271_s18, [#allocation7], %s1138_s20, %s1138_s20, %s1139_s21  }
  0x33   : > { %s293_s22 = sand.u32 1, %s1122_s26   ;;  %p41_p9 = scmp.eq.s32.totalorder %s40_s19, 0 }
  0x34   : > { %s775_s18 = sshll.u32 %s293_s22, 3  ;;  %s776_s20 = sshll.u32 %s1130_s28, 7 }
  0x35   : > { %s1288_s21 = scalar_select %p41_p9, %s1122_s26, %s43_s17  }
  0x36   : > { %s302_s8 = scalar_lea.hbm %s1396_s0, %s776_s20  ;;  %s297_s14 = scalar_lea.vmem [#allocation3], %s775_s18 }
  0x37   : > { %s304_s1 = sshll.u32 %s297_s14, 4  ;;  %p1295_p11 = pnand %p894_p12, %p52_p3  ;;  %s305_s1 = int_to_ptr.vmem [resolvable:$true] %s304_s1 }
  0x38   : > { %s294_s3 = scalar_lea.sflag [#allocation4], %s293_s22  ;;  %s1035_s19 = scalar_lea.vmem %s305_s1, 128 }
  0x39   : > { %p1024_p2 = pneg %p1295_p11  ;;  %p1036_p13 = scmp.ne.s32.totalorder %s305_s1, %s1035_s19 }
  0x3a   : > { %s1140_s17 = smov [#allocation3]  }
  0x3b   : > { %p1038_p0 = pnand %p1036_p13, %p1024_p2  ;;  %s1040_s15 = sshll.u32 %s1140_s17, 4  ;;  %s1041_s15 = int_to_ptr.vmem [resolvable:$false] %s1040_s15 }
  0x3c   : > { %s1042_s20 = scalar_lea.vmem %s1041_s15, 256  ;;  %p1043_p10 = scmp.lt.s32.totalorder %s305_s1, %s1041_s15 }
  0x3d   : > { %p1039_p5 = pneg %p1038_p0  ;;  %p1044_p1 = scmp.lt.s32.totalorder %s1042_s20, %s1035_s19 }
  0x3f   : > { %p1045_p4 = por %p1044_p1, %p1043_p10 }
  0x41   : > { %p1046_p6 = pnand %p1045_p4, %p1039_p5 }
  0x43   : > { %1049 = shalt.err (!%p1046_p6)
}
  0x44   : > { %887 = dma.hbm_to_vmem [thread:$0]  (!%p1295_p11), %s302_s8, 128, %s305_s1, %s294_s3  }
  0x45   : > { %313 = sbr.rel (%p1238_p8) target bundleno = 829 (0x33d), region = 48  ;;  %s1306_s22 = sand.u32 (!%p1238_p8), 1, %s1118_s25  }
  0x46   : > { %s778_s18 = sshll.u32 (!%p1238_p8), %s1306_s22, 3  ;;  %s316_s23 = scalar_lea.sflag (!%p1238_p8), [#allocation4], %s1306_s22 }
  0x47   : > { %s1312_s15 = scalar_lea.vmem (!%p1238_p8), [#allocation3], %s778_s18  ;;  %p1421_p12 = scmp.ne.s32.totalorder (!%p1238_p8), %s1412_s11, 0 }
  0x4a   : > { %1101 = dma.done.wait (%p1421_p12), %s316_s23, 128  }
  0x4b   : > { %1103 = vsyncadd (%p1421_p12), %s316_s23, 4294967168  ;;  %p1422_p3 = scmp.ne.s32.totalorder %s1410_s9, 0 }
  0x4d   : > { %1105 = dma.done.wait (%p1422_p3), [#allocation7], 2048  }
  0x4e   : > { %1107 = vsyncadd (%p1422_p3), [#allocation7], 4294965248  ;;  %v1141_v0 = vmov 0.0   ;;  %vm1142_vm0 = vmmov 0   ;;  %v952_v1 = vld [vmem:[#allocation6 + $0x38] sm:$0xff]   ;;  %v953_v2 = vld [vmem:[#allocation6 + $0x30] sm:$0xff]   ;;  %v611_v34 = vlaneseq }
  0x4f   : > { %825 = vmatprep.subr.bf16.mxu0 %v1141_v0  ;;  %841 = vmatprep.mubr.msk.bf16.mxu0 %vm1142_vm0, %v1141_v0  ;;  %v954_v3 = vld [vmem:[#allocation6 + $0x28] sm:$0xff]   ;;  %v960_v4 = vld [vmem:[#allocation8 + $0x38] sm:$0xff]   ;;  %v955_v5 = vld [vmem:[#allocation6 + $0x20] sm:$0xff]   ;;  %s804_s10 = sshll.u32 %s1126_s27, 7  ;;  %s360_s19 = scalar_lea.vmem [#allocation9], %s778_s18 }
  0x50   : > { %845 = vmatprep.subr.bf16.mxu1 %v1141_v0  ;;  %861 = vmatprep.mubr.msk.bf16.mxu1 %vm1142_vm0, %v1141_v0  ;;  %v961_v6 = vld [vmem:[#allocation8 + $0x30] sm:$0xff]   ;;  %v956_v7 = vld [vmem:[#allocation6 + $0x18] sm:$0xff]   ;;  %v962_v8 = vld [vmem:[#allocation8 + $0x28] sm:$0xff]   ;;  %v612_v35 = vand.u32 127, %v611_v34  ;;  %s655_s17 = sshll.u32 %s360_s19, 4  ;;  %s642_s1 = scalar_lea.sflag [#allocation5], %s1306_s22  ;;  %s656_s17 = int_to_ptr.vmem [resolvable:$true] %s655_s17 }
  0x51   : > { %826 = vmatpush3.bf16.msra.mxu0 %v952_v1  ;;  %846 = vmatpush3.bf16.msra.mxu1 %v960_v4  ;;  %v957_v9 = vld [vmem:[#allocation6 + $0x10] sm:$0xff]   ;;  %v963_v10 = vld [vmem:[#allocation8 + $0x20] sm:$0xff]   ;;  %v958_v11 = vld [vmem:[#allocation6 + $0x8] sm:$0xff]   ;;  %s1050_s3 = scalar_lea.vmem %s656_s17, 128  ;;  %s1143_s9 = smov [#allocation9]  }
  0x52   : > { %827 = vmatprep.subr.bf16.mxu0 %v1141_v0  ;;  %847 = vmatprep.subr.bf16.mxu1 %v1141_v0  ;;  %v964_v12 = vld [vmem:[#allocation8 + $0x18] sm:$0xff]   ;;  %v959_v13 = vld [vmem:[#allocation6] sm:$0xff]   ;;  %v965_v15 = vld [vmem:[#allocation8 + $0x10] sm:$0xff]   ;;  %vm613_vm1 = vcmp.lt.s32.totalorder %v612_v35, 32  ;;  %p1051_p8 = scmp.ne.s32.totalorder %s656_s17, %s1050_s3  ;;  %s1054_s11 = sshll.u32 %s1143_s9, 4  ;;  %s1055_s11 = int_to_ptr.vmem [resolvable:$false] %s1054_s11 }
  0x53   : > { %v371_v14 = vld [vmem:[%s1312_s15] sm:$0xff]  ;;  %v966_v17 = vld [vmem:[#allocation8 + $0x8] sm:$0xff]   ;;  %v967_v18 = vld [vmem:[#allocation8] sm:$0xff]   ;;  %v800_v38 = vsel %vm613_vm1, 1.0, %v1141_v0  ;;  %s653_s15 = scalar_lea.hbm %s1403_s7, %s804_s10  ;;  %s1056_s27 = scalar_lea.vmem %s1055_s11, 256 }
  0x54   : > { %v372_v16 = vpack.c.bf16 %v371_v14, %v371_v14  ;;  %v782_v19 = vld [vmem:[%s1398_s2] ss:$0 sm:$0xff]  ;;  %p1052_p9 = pnand %p1051_p8, %p1279_p7  ;;  %p1057_p2 = scmp.lt.s32.totalorder %s656_s17, %s1055_s11 }
  0x55   : > { %828 = vmatpush3.bf16.msra.mxu0 %v953_v2  ;;  %848 = vmatpush3.bf16.msra.mxu1 %v961_v6  ;;  %v799_v28 = vld [vmem:[%s1400_s4] ss:$0 sm:$0xff]  ;;  %p1058_p13 = scmp.lt.s32.totalorder %s1056_s27, %s1050_s3 }
  0x56   : > { %829 = vmatprep.subr.bf16.mxu0 %v1141_v0  ;;  %849 = vmatprep.subr.bf16.mxu1 %v1141_v0  ;;  %v801_v46 = vld [vmem:[%s1401_s5] ss:$0 sm:$0xff]  ;;  %p1053_p11 = pneg %p1052_p9 }
  0x57   : > { %v802_v48 = vld [vmem:[%s1402_s6] ss:$0 sm:$0xff]  ;;  %p1059_p0 = por %p1058_p13, %p1057_p2 }
  0x59   : > { %830 = vmatpush3.bf16.msra.mxu0 %v954_v3  ;;  %850 = vmatpush3.bf16.msra.mxu1 %v962_v8  ;;  %p1060_p5 = pnand %p1059_p0, %p1053_p11 }
  0x5a   : > { %831 = vmatprep.subr.bf16.mxu0 %v1141_v0  ;;  %851 = vmatprep.subr.bf16.mxu1 %v1141_v0 }
  0x5d   : > { %832 = vmatpush3.bf16.msra.mxu0 %v955_v5  ;;  %852 = vmatpush3.bf16.msra.mxu1 %v963_v10 }
  0x5e   : > { %833 = vmatprep.subr.bf16.mxu0 %v1141_v0  ;;  %853 = vmatprep.subr.bf16.mxu1 %v1141_v0 }
  0x61   : > { %834 = vmatpush3.bf16.msra.mxu0 %v956_v7  ;;  %854 = vmatpush3.bf16.msra.mxu1 %v964_v12 }
  0x62   : > { %835 = vmatprep.subr.bf16.mxu0 %v1141_v0  ;;  %855 = vmatprep.subr.bf16.mxu1 %v1141_v0 }
  0x65   : > { %836 = vmatpush3.bf16.msra.mxu0 %v957_v9  ;;  %856 = vmatpush3.bf16.msra.mxu1 %v965_v15 }
  0x66   : > { %837 = vmatprep.subr.bf16.mxu0 %v1141_v0  ;;  %857 = vmatprep.subr.bf16.mxu1 %v1141_v0 }
  0x69   : > { %838 = vmatpush3.bf16.msra.mxu0 %v958_v11  ;;  %858 = vmatpush3.bf16.msra.mxu1 %v966_v17 }
  0x6a   : > { %839 = vmatprep.subr.bf16.mxu0 %v1141_v0  ;;  %859 = vmatprep.subr.bf16.mxu1 %v1141_v0 }
  0x6d   : > { %840 = vmatpush3.bf16.msra.mxu0 %v959_v13  ;;  %860 = vmatpush3.bf16.msra.mxu1 %v967_v18 }
  0x70   : > { %842 = vmatmul.mubr.bf16.vlgmr.msra.gmra.mxu0 %v372_v16 }
 0x130   : > { %v478_v20 = vpop.f32.mrf.mxu0 }
 0x131   : > { %v479_v21 = vadd.f32 %v782_v19, %v478_v20 }
 0x132   : > { %v843_v22 = vpop.f32.mrf.mxu0 }
 0x133   : > { %v484_v23 = vmax.f32 %v479_v21, 0.0 }
 0x134   : > { %v481_v24 = vpop.f32.mrf.mxu0 }
 0x135   : > { %v486_v25 = vpack.c.bf16 %v484_v23, %v484_v23 }
 0x136   : > { %v844_v26 = vpop.f32.mrf.mxu0 }
 0x137   : > { %862 = vmatmul.mubr.bf16.vlgmr.msra.gmra.mxu1 %v486_v25 }
 0x1f7   : > { %v585_v27 = vpop.f32.mrf.mxu1 }
 0x1f8   : > { %v598_v29 = vadd.f32 %v585_v27, %v371_v14 }
 0x1f9   : > { %v863_v30 = vpop.f32.mrf.mxu1 }
 0x1fa   : > { %v606_v31 = vadd.f32 %v799_v28, %v598_v29 }
 0x1fb   : > { %v588_v32 = vpop.f32.mrf.mxu1 }
 0x1fc   : > { %607 = vadd.xlane.f32.xlu0 %v606_v31 }
 0x1fd   : > { %v864_v33 = vpop.f32.mrf.mxu1 }
 0x285   : > { %v608_v36 = vpop.xlane.xlu0 %607 }
 0x286   : > { %v609_v37 = vmul.f32 0.03125, %v608_v36 }
 0x288   : > { %v610_v39 = vsub.f32 %v606_v31, %v609_v37 }
 0x28a   : > { %v616_v40 = vmul.f32 %v800_v38, %v610_v39 }
 0x28c   : > { %v617_v41 = vmul.f32 %v616_v40, %v616_v40 }
 0x28e   : > { %618 = vadd.xlane.f32.xlu0 %v617_v41 }
 0x317   : > { %v619_v42 = vpop.xlane.xlu0 %618 }
 0x318   : > { %v620_v43 = vmul.f32 0.03125, %v619_v42 }
 0x31a   : > { %v621_v44 = vadd.f32 1e-05, %v620_v43 }
 0x31c   : > { %968 = vrsqrt.f32 %v621_v44 }
 0x329   : > { %v969_v45 = vpop.eup %968 }
 0x32a   : > { %v623_v47 = vmul.f32 %v969_v45, %v610_v39 }
 0x32c   : > { %v631_v49 = vmul.f32 %v801_v46, %v623_v47 }
 0x32e   : > { %v639_v50 = vadd.f32 %v802_v48, %v631_v49 }
 0x330   : > { %640 = vst [vmem:[%s360_s19] sm:$0xff] %v639_v50 }
 0x331   : > { %1063 = shalt.err (!%p1060_p5)
}
 0x332   : > { %s1064_s18 = scalar_lea.hbm %s653_s15, 128  ;;  %s1068_s30 = scalar_lea.hbm %s1403_s7, 256 }
 0x333   : > { %p1065_p10 = scmp.ne.s32.totalorder %s653_s15, %s1064_s18  ;;  %p1069_p6 = scmp.lt.s32.totalorder %s653_s15, %s1403_s7 }
 0x334   : > { %p1070_p12 = scmp.lt.s32.totalorder %s1068_s30, %s1064_s18 }
 0x335   : > { %p1066_p1 = pnand %p1065_p10, %p1279_p7 }
 0x336   : > { %p1071_p3 = por %p1070_p12, %p1069_p6 }
 0x337   : > { %p1067_p4 = pneg %p1066_p1 }
 0x339   : > { %p1072_p8 = pnand %p1071_p3, %p1067_p4 }
 0x33b   : > { %1075 = shalt.err (!%p1072_p8)
}
 0x33c   : > { %875 = dma.vmem_to_hbm [thread:$0]  (%p1279_p7), %s656_s17, 128, %s653_s15, %s642_s1  }
 0x33d PF: > { %s667_s10 = sand.u32 1, %s1114_s24   ;;  %p1423_p9 = scmp.ne.s32.totalorder %s1413_s12, 0 }
 0x33e   : > { %p1424_p11 = scmp.ge.s32.totalorder %s1134_s29, 2  ;;  %s668_s19 = scalar_lea.sflag [#allocation5], %s667_s10 }
 0x340   : > { %p889_p2 = pnand %p1424_p11, %p1423_p9 }
 0x342   : > { %p890_p13 = pneg %p889_p2 }
 0x344   : > { %1109 = dma.done.wait (%p890_p13), %s668_s19, 128  }
 0x345   : > { %1111 = vsyncadd (%p890_p13), %s668_s19, 4294967168  ;;  %s24_s29 = sadd.s32 1, %s1134_s29   ;;  %s1425_s16 = sld [smem:[#allocation13_spill]] }
 0x346   : > { %p21_p0 = scmp.ge.s32.totalorder %s24_s29, 4   ;;  %s1426_s24 = smov %s1118_s25 }
 0x347   : > { %s1427_s25 = smov %s1122_s26  ;;  %s1428_s26 = smov %s1288_s21 }
 0x348   : > { %s1429_s27 = smov %s1130_s28  ;;  %23 = sbr.rel (!%p21_p0) target bundleno = 10 (0xa), region = 114 }
 0x34b   : > { %s1430_s28 = smov %s1425_s16 }
 0x34d   :  { %673 = vsyncpa [#allocation4], 1 }
 0x34e   :  { %675 = vsyncpa [#allocation4 + $0x1], 1 }
 0x34f   :  { %676 = vsyncpa [#allocation7], 1 }
 0x350   :  { %677 = vsyncpa [#allocation5], 1 }
 0x351   :  { %679 = vsyncpa [#allocation5 + $0x1], 1 }

</bundles_post_ra>
